<compile_context>
chip_gen: v5e
topology: v5e:2x2
jax: 0.10.0
libtpu: 0.0.40
codegen_flags: <defaults>
</compile_context>

<pallas_src>
import functools

import jax
import jax.numpy as jnp
from jax.experimental import pallas as pl
from jax.experimental.pallas import tpu as pltpu

_SUB = 8            # sublanes per f32 vreg tile
_LANE = 128         # lanes per vreg tile
_MAX_BLK_ROWS = 2048  # 2048x128 f32 block = 1 MiB; safe on v5e/v6e/v7x VMEM
_MAX_CORES = 2      # leading "parallel" grid axis; sharded across TCs on v7x


def _dice_partial_kernel(rows, full_blocks, p_ref, t_ref, o_ref,
                         inter_acc, sq_acc):
    """Accumulates per-core partial sums of p*t and (p+t)^2.

    `rows` and `full_blocks` are static Python ints baked at trace time (they
    become jaxpr literals, not captured array constants). o_ref is a
    (1, 8, 128) slab per core: sublane 0 holds the intersection partial,
    sublane 1 holds sum((p+t)^2).
    """
    c = pl.program_id(0)
    i = pl.program_id(1)
    inner = pl.num_programs(1)
    blk = c * inner + i                     # intended (unclamped) block index
    block_rows = p_ref.shape[0]

    @pl.when(i == 0)
    def _init():
        inter_acc[...] = jnp.zeros_like(inter_acc)
        sq_acc[...] = jnp.zeros_like(sq_acc)

    def _accumulate(p, t):
        s = p + t
        # Sublane-aligned partial reduce: pure VPU adds into the (8, 128)
        # accumulators; the cross-lane reduce is deferred to the last step.
        inter_acc[...] += jnp.sum((p * t).reshape(-1, _SUB, _LANE), axis=0)
        sq_acc[...] += jnp.sum((s * s).reshape(-1, _SUB, _LANE), axis=0)

    @pl.when(blk < full_blocks)
    def _full_block():
        _accumulate(p_ref[...].astype(jnp.float32),
                    t_ref[...].astype(jnp.float32))

    @pl.when(blk >= full_blocks)
    def _tail_block():
        # Partial last block (or a clamped duplicate on an uneven core split):
        # zero out rows past the true end of the input.
        row = jax.lax.broadcasted_iota(jnp.int32, (block_rows, _LANE), 0)
        keep = blk * block_rows + row < rows
        p = jnp.where(keep, p_ref[...].astype(jnp.float32), 0.0)
        t = jnp.where(keep, t_ref[...].astype(jnp.float32), 0.0)
        _accumulate(p, t)

    @pl.when(i == inner - 1)
    def _finalize():
        inter = jnp.sum(inter_acc[...])
        sq = jnp.sum(sq_acc[...])
        sub = jax.lax.broadcasted_iota(jnp.int32, o_ref.shape, 1)
        o_ref[...] = jnp.where(sub == 0, inter,
                               jnp.where(sub == 1, sq, 0.0)).astype(o_ref.dtype)


@functools.partial(jax.jit, static_argnames=("eps",))
def dice_coefficient(prediction, target, eps=1e-6):
    assert prediction.shape == target.shape

    # Keep native dtypes; the f32 upcast happens in-kernel.
    p = prediction.reshape(-1)
    t = target.reshape(-1)
    n = p.shape[0]

    # Pad (only when needed) so the flat vector reshapes to a lane-dense
    # (rows, 128) slab with rows % 8 == 0.  Zero padding leaves all three sums
    # unchanged; for typical sizes (multiples of 1024) this is a no-op.
    tile = _SUB * _LANE
    pad = (-n) % tile
    if pad:
        p = jnp.pad(p, (0, pad))
        t = jnp.pad(t, (0, pad))
    rows = (n + pad) // _LANE
    p2 = p.reshape(rows, _LANE)
    t2 = t.reshape(rows, _LANE)

    block_rows = min(_MAX_BLK_ROWS, rows)          # always a multiple of 8
    nblocks = pl.cdiv(rows, block_rows)
    full_blocks = rows // block_rows               # blocks with no ragged tail
    ncores = min(_MAX_CORES, nblocks)
    inner = pl.cdiv(nblocks, ncores)

    def in_index(c, i):
        # Clamp so the DMA never reads past the array; ragged / duplicated
        # contributions are masked to zero inside the kernel.
        return (jnp.minimum(c * inner + i, nblocks - 1), 0)

    partials = pl.pallas_call(
        functools.partial(_dice_partial_kernel, rows, full_blocks),
        out_shape=jax.ShapeDtypeStruct((ncores, _SUB, _LANE), jnp.float32),
        grid_spec=pltpu.PrefetchScalarGridSpec(
            num_scalar_prefetch=0,
            grid=(ncores, inner),
            in_specs=[
                pl.BlockSpec((block_rows, _LANE), in_index),
                pl.BlockSpec((block_rows, _LANE), in_index),
            ],
            out_specs=pl.BlockSpec((1, _SUB, _LANE), lambda c, i: (c, 0, 0)),
            scratch_shapes=[
                pltpu.VMEM((_SUB, _LANE), jnp.float32),
                pltpu.VMEM((_SUB, _LANE), jnp.float32),
            ],
        ),
        compiler_params=pltpu.CompilerParams(
            # Leading axis shards row blocks across TensorCores (2x on v7x);
            # inner axis is the sequential reduction over row blocks.
            dimension_semantics=("parallel", "arbitrary"),
        ),
    )(p2, t2)

    inter = jnp.sum(partials[:, 0, 0])
    sum_sq = jnp.sum(partials[:, 1, 0])
    union = sum_sq - 2.0 * inter           # (p+t)^2 = p^2 + t^2 + 2pt
    return 2.0 * inter / jnp.maximum(union, eps)


if __name__ == "__main__":
    key = jax.random.PRNGKey(0)
    kp, kt = jax.random.split(key)

    # Segmentation-style shapes: N=2, C=4, H=W=16.
    prediction = jax.random.uniform(kp, (2, 4, 16, 16), dtype=jnp.float32)
    target = (jax.random.uniform(kt, (2, 4, 16, 16)) > 0.5).astype(jnp.float32)

    result = dice_coefficient(prediction, target)
    result = jax.block_until_ready(result)

    # Pure-JAX reference check.
    inter = jnp.sum(prediction * target)
    union = jnp.sum(prediction * prediction) + jnp.sum(target * target)
    ref = 2.0 * inter / jnp.maximum(union, 1e-6)
    assert jnp.allclose(result, ref, rtol=1e-5, atol=1e-6), (result, ref)

    print("KERNEL_OK")
</pallas_src>

<mosaic_0001>
module attributes {stable_mosaic.version = 11 : i64} {
  func.func @_dice_partial_kernel(%arg0: i32, %arg1: i32, %arg2: memref<16x128xf32, #tpu.memory_space<vmem>>, %arg3: memref<16x128xf32, #tpu.memory_space<vmem>>, %arg4: memref<1x8x128xf32, #tpu.memory_space<vmem>>, %arg5: memref<8x128xf32, #tpu.memory_space<vmem>>, %arg6: memref<8x128xf32, #tpu.memory_space<vmem>>) attributes {dimension_semantics = [#tpu.dimension_semantics<parallel>, #tpu.dimension_semantics<arbitrary>], iteration_bounds = array<i64: 1, 1>, scalar_prefetch = 0 : i64, scratch_operands = 2 : i64, tpu.core_type = #tpu.core_type<tc>, window_params = [{transform_indices = @transform_0, window_bounds = array<i64: 16, 128>}, {transform_indices = @transform_1, window_bounds = array<i64: 16, 128>}, {transform_indices = @transform_2, window_bounds = array<i64: 1, 8, 128>}]} {
    %c1_i32 = arith.constant 1 : i32
    %0 = arith.muli %arg0, %c1_i32 : i32
    %1 = arith.addi %0, %arg1 : i32
    %c0_i32 = arith.constant 0 : i32
    %2 = arith.cmpi eq, %arg1, %c0_i32 : i32
    %3 = arith.extui %2 : i1 to i32
    %c0_i32_0 = arith.constant 0 : i32
    %4 = arith.cmpi ne, %3, %c0_i32_0 : i32
    scf.if %4 {
      %cst = arith.constant 0.000000e+00 : f32
      %14 = vector.broadcast %cst : f32 to vector<8x128xf32>
      %c0 = arith.constant 0 : index
      %c0_7 = arith.constant 0 : index
      %15 = vector.load %arg5[%c0, %c0_7] : memref<8x128xf32, #tpu.memory_space<vmem>>, vector<8x128xf32>
      tpu.vector_store %arg5[%c0, %c0_7], %14 {strides = array<i32>} : memref<8x128xf32, #tpu.memory_space<vmem>>, vector<8x128xf32>,
      %cst_8 = arith.constant 0.000000e+00 : f32
      %16 = vector.broadcast %cst_8 : f32 to vector<8x128xf32>
      %c0_9 = arith.constant 0 : index
      %c0_10 = arith.constant 0 : index
      %17 = vector.load %arg6[%c0_9, %c0_10] : memref<8x128xf32, #tpu.memory_space<vmem>>, vector<8x128xf32>
      tpu.vector_store %arg6[%c0_9, %c0_10], %16 {strides = array<i32>} : memref<8x128xf32, #tpu.memory_space<vmem>>, vector<8x128xf32>,
    } else {
    }
    %c1_i32_1 = arith.constant 1 : i32
    %5 = arith.cmpi slt, %1, %c1_i32_1 : i32
    %6 = arith.extui %5 : i1 to i32
    %c0_i32_2 = arith.constant 0 : i32
    %7 = arith.cmpi ne, %6, %c0_i32_2 : i32
    scf.if %7 {
      %c0 = arith.constant 0 : index
      %c0_7 = arith.constant 0 : index
      %14 = vector.load %arg2[%c0, %c0_7] : memref<16x128xf32, #tpu.memory_space<vmem>>, vector<16x128xf32>
      %c0_8 = arith.constant 0 : index
      %c0_9 = arith.constant 0 : index
      %15 = vector.load %arg3[%c0_8, %c0_9] : memref<16x128xf32, #tpu.memory_space<vmem>>, vector<16x128xf32>
      %16 = arith.addf %14, %15 : vector<16x128xf32>
      %c0_10 = arith.constant 0 : index
      %c0_11 = arith.constant 0 : index
      %17 = vector.load %arg5[%c0_10, %c0_11] : memref<8x128xf32, #tpu.memory_space<vmem>>, vector<8x128xf32>
      %18 = arith.mulf %14, %15 : vector<16x128xf32>
      %19 = vector.shape_cast %18 : vector<16x128xf32> to vector<2x8x128xf32>
      %cst = arith.constant dense<0.000000e+00> : vector<8x128xf32>
      %20 = vector.multi_reduction <add>, %19, %cst [0] : vector<2x8x128xf32> to vector<8x128xf32>
      %21 = arith.addf %17, %20 : vector<8x128xf32>
      %c0_12 = arith.constant 0 : index
      %c0_13 = arith.constant 0 : index
      %22 = vector.load %arg5[%c0_12, %c0_13] : memref<8x128xf32, #tpu.memory_space<vmem>>, vector<8x128xf32>
      tpu.vector_store %arg5[%c0_12, %c0_13], %21 {strides = array<i32>} : memref<8x128xf32, #tpu.memory_space<vmem>>, vector<8x128xf32>,
      %c0_14 = arith.constant 0 : index
      %c0_15 = arith.constant 0 : index
      %23 = vector.load %arg6[%c0_14, %c0_15] : memref<8x128xf32, #tpu.memory_space<vmem>>, vector<8x128xf32>
      %24 = arith.mulf %16, %16 : vector<16x128xf32>
      %25 = vector.shape_cast %24 : vector<16x128xf32> to vector<2x8x128xf32>
      %cst_16 = arith.constant dense<0.000000e+00> : vector<8x128xf32>
      %26 = vector.multi_reduction <add>, %25, %cst_16 [0] : vector<2x8x128xf32> to vector<8x128xf32>
      %27 = arith.addf %23, %26 : vector<8x128xf32>
      %c0_17 = arith.constant 0 : index
      %c0_18 = arith.constant 0 : index
      %28 = vector.load %arg6[%c0_17, %c0_18] : memref<8x128xf32, #tpu.memory_space<vmem>>, vector<8x128xf32>
      tpu.vector_store %arg6[%c0_17, %c0_18], %27 {strides = array<i32>} : memref<8x128xf32, #tpu.memory_space<vmem>>, vector<8x128xf32>,
    } else {
    }
    %c1_i32_3 = arith.constant 1 : i32
    %8 = arith.cmpi sge, %1, %c1_i32_3 : i32
    %9 = arith.extui %8 : i1 to i32
    %c0_i32_4 = arith.constant 0 : i32
    %10 = arith.cmpi ne, %9, %c0_i32_4 : i32
    scf.if %10 {
      %14 = tpu.iota {dimensions = array<i32: 0>} : vector<16x128xi32>
      %c16_i32 = arith.constant 16 : i32
      %15 = arith.muli %1, %c16_i32 : i32
      %16 = vector.broadcast %15 : i32 to vector<16x128xi32>
      %17 = arith.addi %16, %14 : vector<16x128xi32>
      %c16_i32_7 = arith.constant 16 : i32
      %18 = vector.broadcast %c16_i32_7 : i32 to vector<16x128xi32>
      %19 = arith.cmpi slt, %17, %18 : vector<16x128xi32>
      %c0 = arith.constant 0 : index
      %c0_8 = arith.constant 0 : index
      %20 = vector.load %arg2[%c0, %c0_8] : memref<16x128xf32, #tpu.memory_space<vmem>>, vector<16x128xf32>
      %cst = arith.constant 0.000000e+00 : f32
      %21 = vector.broadcast %cst : f32 to vector<16x128xf32>
      %22 = arith.select %19, %20, %21 : vector<16x128xi1>, vector<16x128xf32>
      %c0_9 = arith.constant 0 : index
      %c0_10 = arith.constant 0 : index
      %23 = vector.load %arg3[%c0_9, %c0_10] : memref<16x128xf32, #tpu.memory_space<vmem>>, vector<16x128xf32>
      %cst_11 = arith.constant 0.000000e+00 : f32
      %24 = vector.broadcast %cst_11 : f32 to vector<16x128xf32>
      %25 = arith.select %19, %23, %24 : vector<16x128xi1>, vector<16x128xf32>
      %26 = arith.addf %22, %25 : vector<16x128xf32>
      %c0_12 = arith.constant 0 : index
      %c0_13 = arith.constant 0 : index
      %27 = vector.load %arg5[%c0_12, %c0_13] : memref<8x128xf32, #tpu.memory_space<vmem>>, vector<8x128xf32>
      %28 = arith.mulf %22, %25 : vector<16x128xf32>
      %29 = vector.shape_cast %28 : vector<16x128xf32> to vector<2x8x128xf32>
      %cst_14 = arith.constant dense<0.000000e+00> : vector<8x128xf32>
      %30 = vector.multi_reduction <add>, %29, %cst_14 [0] : vector<2x8x128xf32> to vector<8x128xf32>
      %31 = arith.addf %27, %30 : vector<8x128xf32>
      %c0_15 = arith.constant 0 : index
      %c0_16 = arith.constant 0 : index
      %32 = vector.load %arg5[%c0_15, %c0_16] : memref<8x128xf32, #tpu.memory_space<vmem>>, vector<8x128xf32>
      tpu.vector_store %arg5[%c0_15, %c0_16], %31 {strides = array<i32>} : memref<8x128xf32, #tpu.memory_space<vmem>>, vector<8x128xf32>,
      %c0_17 = arith.constant 0 : index
      %c0_18 = arith.constant 0 : index
      %33 = vector.load %arg6[%c0_17, %c0_18] : memref<8x128xf32, #tpu.memory_space<vmem>>, vector<8x128xf32>
      %34 = arith.mulf %26, %26 : vector<16x128xf32>
      %35 = vector.shape_cast %34 : vector<16x128xf32> to vector<2x8x128xf32>
      %cst_19 = arith.constant dense<0.000000e+00> : vector<8x128xf32>
      %36 = vector.multi_reduction <add>, %35, %cst_19 [0] : vector<2x8x128xf32> to vector<8x128xf32>
      %37 = arith.addf %33, %36 : vector<8x128xf32>
      %c0_20 = arith.constant 0 : index
      %c0_21 = arith.constant 0 : index
      %38 = vector.load %arg6[%c0_20, %c0_21] : memref<8x128xf32, #tpu.memory_space<vmem>>, vector<8x128xf32>
      tpu.vector_store %arg6[%c0_20, %c0_21], %37 {strides = array<i32>} : memref<8x128xf32, #tpu.memory_space<vmem>>, vector<8x128xf32>,
    } else {
    }
    %c0_i32_5 = arith.constant 0 : i32
    %11 = arith.cmpi eq, %arg1, %c0_i32_5 : i32
    %12 = arith.extui %11 : i1 to i32
    %c0_i32_6 = arith.constant 0 : i32
    %13 = arith.cmpi ne, %12, %c0_i32_6 : i32
    scf.if %13 {
      %c0 = arith.constant 0 : index
      %c0_7 = arith.constant 0 : index
      %14 = vector.load %arg5[%c0, %c0_7] : memref<8x128xf32, #tpu.memory_space<vmem>>, vector<8x128xf32>
      %15 = vector.shape_cast %14 : vector<8x128xf32> to vector<1x8x128xf32>
      %cst = arith.constant dense<0.000000e+00> : vector<1xf32>
      %16 = vector.multi_reduction <add>, %15, %cst [1, 2] : vector<1x8x128xf32> to vector<1xf32>
      %17 = vector.shape_cast %16 : vector<1xf32> to vector<1x1x1xf32>
      %18 = vector.extract %17[0, 0, 0] : f32 from vector<1x1x1xf32>
      %c0_8 = arith.constant 0 : index
      %c0_9 = arith.constant 0 : index
      %19 = vector.load %arg6[%c0_8, %c0_9] : memref<8x128xf32, #tpu.memory_space<vmem>>, vector<8x128xf32>
      %20 = vector.shape_cast %19 : vector<8x128xf32> to vector<1x8x128xf32>
      %cst_10 = arith.constant dense<0.000000e+00> : vector<1xf32>
      %21 = vector.multi_reduction <add>, %20, %cst_10 [1, 2] : vector<1x8x128xf32> to vector<1xf32>
      %22 = vector.shape_cast %21 : vector<1xf32> to vector<1x1x1xf32>
      %23 = vector.extract %22[0, 0, 0] : f32 from vector<1x1x1xf32>
      %24 = tpu.iota {dimensions = array<i32: 1>} : vector<1x8x128xi32>
      %c0_i32_11 = arith.constant 0 : i32
      %25 = vector.broadcast %c0_i32_11 : i32 to vector<1x8x128xi32>
      %26 = arith.cmpi eq, %24, %25 : vector<1x8x128xi32>
      %c1_i32_12 = arith.constant 1 : i32
      %27 = vector.broadcast %c1_i32_12 : i32 to vector<1x8x128xi32>
      %28 = arith.cmpi eq, %24, %27 : vector<1x8x128xi32>
      %cst_13 = arith.constant 0.000000e+00 : f32
      %29 = vector.broadcast %23 : f32 to vector<1x8x128xf32>
      %30 = vector.broadcast %cst_13 : f32 to vector<1x8x128xf32>
      %31 = arith.select %28, %29, %30 : vector<1x8x128xi1>, vector<1x8x128xf32>
      %32 = vector.broadcast %18 : f32 to vector<1x8x128xf32>
      %33 = arith.select %26, %32, %31 : vector<1x8x128xi1>, vector<1x8x128xf32>
      %c0_14 = arith.constant 0 : index
      %c0_15 = arith.constant 0 : index
      %c0_16 = arith.constant 0 : index
      %34 = vector.load %arg4[%c0_14, %c0_15, %c0_16] : memref<1x8x128xf32, #tpu.memory_space<vmem>>, vector<1x8x128xf32>
      tpu.vector_store %arg4[%c0_14, %c0_15, %c0_16], %33 {strides = array<i32>} : memref<1x8x128xf32, #tpu.memory_space<vmem>>, vector<1x8x128xf32>,
    } else {
    }
    return
  }
  func.func @transform_0(%arg0: i32, %arg1: i32) -> (i32, i32) {
    %c1_i32 = arith.constant 1 : i32
    %0 = arith.muli %arg0, %c1_i32 : i32
    %1 = arith.addi %0, %arg1 : i32
    %c0_i32 = arith.constant 0 : i32
    %2 = arith.minsi %1, %c0_i32 : i32
    %c0_i32_0 = arith.constant 0 : i32
    %c0_i32_1 = arith.constant 0 : i32
    return %2, %c0_i32_0 : i32, i32
  }
  func.func @transform_1(%arg0: i32, %arg1: i32) -> (i32, i32) {
    %c1_i32 = arith.constant 1 : i32
    %0 = arith.muli %arg0, %c1_i32 : i32
    %1 = arith.addi %0, %arg1 : i32
    %c0_i32 = arith.constant 0 : i32
    %2 = arith.minsi %1, %c0_i32 : i32
    %c0_i32_0 = arith.constant 0 : i32
    %c0_i32_1 = arith.constant 0 : i32
    return %2, %c0_i32_0 : i32, i32
  }
  func.func @transform_2(%arg0: i32, %arg1: i32) -> (i32, i32, i32) {
    %c0_i32 = arith.constant 0 : i32
    %c0_i32_0 = arith.constant 0 : i32
    %c0_i32_1 = arith.constant 0 : i32
    return %arg0, %c0_i32, %c0_i32_0 : i32, i32, i32
  }
}

</mosaic_0001>

<bundles_post_ra>
// kernel: dice_coefficient.1
= control target key start
LH: loop header
LB: loop body
LE: loop exit
PB: predicated region body
PF: predicated region fallthrough
CT: control target
= control target key end

     0   :  { %v162_v26 = vlaneseq  ;;  %s221_s0 = inlined_call_operand.vmem [shape: f32[16,128], index: 0, kind: input, shape index: {}]   ;;  %s222_s1 = inlined_call_operand.vmem [shape: f32[16,128], index: 1, kind: input, shape index: {}]   ;;  %s223_s2 = inlined_call_operand.vmem [shape: f32[1,8,128], index: 2, kind: output, shape index: {}]  }
   0x1   :  { %v86_v0 = vld [vmem:[%s221_s0] sm:$0xff]  ;;  %v87_v1 = vld [vmem:[%s221_s0 + $0x8] sm:$0xff] }
   0x2   :  { %v88_v2 = vld [vmem:[%s222_s1] sm:$0xff]  ;;  %v89_v3 = vld [vmem:[%s222_s1 + $0x8] sm:$0xff]  ;;  %v163_v27 = vshrl.u32 %v162_v26, 7 }
   0x3   :  { %v93_v4 = vmul.f32 %v88_v2, %v86_v0  ;;  %v94_v5 = vmul.f32 %v89_v3, %v87_v1  ;;  %v90_v6 = vadd.f32 %v88_v2, %v86_v0  ;;  %v91_v7 = vadd.f32 %v89_v3, %v87_v1 }
   0x4   :  { %vm165_vm0 = vcmp.eq.s32.totalorder %v163_v27, 1  ;;  %vm164_vm1 = vcmp.eq.s32.totalorder %v163_v27, 0 }
   0x5   :  { %v95_v8 = vadd.f32 %v94_v5, %v93_v4  ;;  %v99_v9 = vmul.f32 %v90_v6, %v90_v6  ;;  %v100_v10 = vmul.f32 %v91_v7, %v91_v7 }
   0x7   :  { %143 = vadd.xlane.f32.xlu0 %v95_v8  ;;  %v101_v11 = vadd.f32 %v100_v10, %v99_v9 }
   0xf   :  { %153 = vadd.xlane.f32.xlu0 %v101_v11 }
  0x7a   :  { %v144_v12 = vpop.xlane.xlu0 %143 }
  0x7b   :  { %v145_v13 = vrot.slane %v144_v12, 4 }
  0x7d   :  { %v146_v14 = vadd.f32 %v145_v13, %v144_v12 }
  0x7f   :  { %v147_v15 = vrot.slane %v146_v14, 2 }
  0x81   :  { %v148_v16 = vadd.f32 %v147_v15, %v146_v14 }
  0x82   :  { %v154_v17 = vpop.xlane.xlu0 %153 }
  0x83   :  { %v155_v18 = vrot.slane %v154_v17, 4  ;;  %v149_v19 = vrot.slane %v148_v16, 1 }
  0x85   :  { %v156_v20 = vadd.f32 %v155_v18, %v154_v17  ;;  %v150_v21 = vadd.f32 %v149_v19, %v148_v16 }
  0x87   :  { %v157_v22 = vrot.slane %v156_v20, 2  ;;  %187 = vpush %v150_v21 }
  0x89   :  { %v158_v23 = vadd.f32 %v157_v22, %v156_v20 }
  0x8b   :  { %v159_v24 = vrot.slane %v158_v23, 1 }
  0x8d   :  { %v160_v25 = vadd.f32 %v159_v24, %v158_v23 }
  0x8f   :  { %189 = vpush %v160_v25 }
  0xb8   :  { %s188_s0 = spop %187 }
  0xb9   :  { %v168_v29 = vstv %s188_s0 }
  0xc0   :  { %s190_s1 = spop %189 }
  0xc1   :  { %v166_v28 = vstv %s190_s1 }
  0xc2   :  { %v167_v30 = vsel %vm165_vm0, %v166_v28, 0.0 }
  0xc3   :  { %v169_v31 = vsel %vm164_vm1, %v168_v29, %v167_v30 }
  0xc4   :  { %170 = vst [vmem:[%s223_s2] sm:$0xff] %v169_v31 }

</bundles_post_ra>
